<compile_context>
chip_gen: v7x
topology: tpu7x:2x2x1
jax: 0.10.0
libtpu: 0.0.40
codegen_flags: <defaults>
</compile_context>

<pallas_src>
import functools

import jax
import jax.numpy as jnp
from jax import lax
from jax.experimental import pallas as pl
from jax.experimental.pallas import tpu as pltpu

NB_LEVELS = 4
N_PARAMS = 7            # [tx, ty, tz, qx, qy, qz, qw]
N_TRANS = 3
EPS = 1e-10
_LEVEL_MIX = (0.2, 0.4, 0.8, 1.6)   # mixing weights for pyramid levels 1..4
_MAX_TILE_B = 16384                 # lanes per grid step (~5 MB VMEM double-buffered)


def _round_up(x, m):
    return ((x + m - 1) // m) * m


def _cdiv(a, b):
    return (a + b - 1) // b


def _pwclonet_partial_kernel(pred_ref, gt_ref, out_ref, acc_ref, *,
                             batch, tile_b, tiles_per_split, total_tiles,
                             need_mask):
    """Per-(split, tile) partial-sum kernel.

    pred_ref : VMEM (4, 7, TB)   predicted params, all levels; batch on lanes.
    gt_ref   : VMEM (7, TB)      ground-truth params; batch on lanes.
    out_ref  : VMEM (8, 1)       per-split row sums:
                                   rows 0..3 : sum_b sum_xyz sqrt((t - gt_t)^2 + eps)
                                   rows 4..7 : sum_b sqrt(sum_q (q_n - gt_q)^2 + eps)
    acc_ref  : VMEM (8, TB) f32  accumulator, persists across the inner grid axis.
    """
    split = pl.program_id(0)
    step = pl.program_id(1)

    @pl.when(step == 0)
    def _init():
        acc_ref[...] = jnp.zeros_like(acc_ref)

    # DMA happened in the producer dtype; arithmetic stays in f32 (v5e has no bf16 VPU).
    x = pred_ref[...].astype(jnp.float32)          # (4, 7, TB)
    g = gt_ref[...].astype(jnp.float32)            # (7, TB)

    # Static row mask on the packed 7-param layout: rows 0..2 = translation,
    # rows 3..6 = quaternion.  Keeping everything on the packed layout avoids a second
    # sublane-padded operand set.
    row = lax.broadcasted_iota(jnp.int32, (1, N_PARAMS, 1), 1)
    is_rot = row >= N_TRANS                        # (1, 7, 1)

    # __norm on the quaternion rows only: q / (sqrt(sum(q*q) + eps) + eps).
    xsq = x * x
    rot_sq = jnp.sum(jnp.where(is_rot, xsq, 0.0), axis=1, keepdims=True)   # (4, 1, TB)
    denom = jnp.sqrt(rot_sq + EPS) + EPS
    inv = pl.reciprocal(denom, approx=True)        # EUP slot
    inv = inv * (2.0 - denom * inv)                # Newton step (~1-2 ulp of exact div)
    xn = jnp.where(is_rot, x * inv, x)             # quat rows normalized, trans rows raw

    d = xn - g[None, :, :]                         # (4, 7, TB)
    dsq = d * d
    # Translation (__trans_loss): per-element sqrt(d^2 + eps), summed over the 3 rows.
    trans_per = jnp.sum(jnp.where(is_rot, 0.0, jnp.sqrt(dsq + EPS)), axis=1)  # (4, TB)
    # Rotation (__l2_norm): sqrt(sum over the 4 quat rows of d^2 + eps) per sample.
    rot_per = jnp.sqrt(jnp.sum(jnp.where(is_rot, dsq, 0.0), axis=1) + EPS)    # (4, TB)

    tile_idx = split * tiles_per_split + step      # global batch-tile index (scalar)

    if need_mask:
        # Only the last real tile can contain columns >= batch (phantom tiles past
        # total_tiles get an all-false mask); the steady state stays unmasked.
        @pl.when(tile_idx < total_tiles - 1)
        def _accumulate_full():
            acc_ref[0:NB_LEVELS, :] += trans_per
            acc_ref[NB_LEVELS:2 * NB_LEVELS, :] += rot_per

        @pl.when(tile_idx >= total_tiles - 1)
        def _accumulate_masked():
            lane = lax.broadcasted_iota(jnp.int32, (1, tile_b), 1)
            valid = (tile_idx * tile_b + lane) < batch              # (1, TB)
            acc_ref[0:NB_LEVELS, :] += jnp.where(valid, trans_per, 0.0)
            acc_ref[NB_LEVELS:2 * NB_LEVELS, :] += jnp.where(valid, rot_per, 0.0)
    else:
        acc_ref[0:NB_LEVELS, :] += trans_per
        acc_ref[NB_LEVELS:2 * NB_LEVELS, :] += rot_per

    @pl.when(step == tiles_per_split - 1)
    def _finalize():
        # Single cross-lane reduce; the (8, 1) per-split partial goes to the wrapper.
        out_ref[...] = jnp.sum(acc_ref[...], axis=-1, keepdims=True)


@functools.partial(jax.jit, static_argnames=("with_exp_weights",))
def pwclonet_loss(pred_params, gt_params, s_param, loss_weights,
                  with_exp_weights=True):
    """Forward pass of _PWCLONetLossModule (loss_option='l2_norm', loss_degrees=False).

    pred_params : (B, 4, 7)  [tx,ty,tz,qx,qy,qz,qw] per pyramid level
    gt_params   : (B, 7)
    s_param     : (2,)       ExponentialWeights parameters [s_trans, s_rot]
    loss_weights: (2,)       fixed weights, used when with_exp_weights=False
    """
    batch = pred_params.shape[0]
    assert pred_params.shape == (batch, NB_LEVELS, N_PARAMS)
    assert gt_params.shape == (batch, N_PARAMS)

    s_param = s_param.astype(jnp.float32)
    loss_weights = loss_weights.astype(jnp.float32)

    # Lane-major layout: batch -> lanes, (level, param) -> leading/sublane axes.
    # Producer dtype is kept; the f32 cast happens inside the kernel after the DMA.
    pred_t = jnp.transpose(pred_params, (1, 2, 0))          # (4, 7, B)
    gt_t = jnp.transpose(gt_params, (1, 0))                 # (7, B)
    # TODO(synk): this transpose is still one extra HBM round trip of the inputs; the
    # real fix is emitting the (4, 7, B) layout from the upstream pred_params kernel.

    # Pad only to the 128-lane granule (<=127 zero columns); anything beyond that is a
    # partial last block handled by the in-kernel lane mask.
    b_pad = _round_up(batch, 128)
    if b_pad != batch:
        pred_t = jnp.pad(pred_t, ((0, 0), (0, 0), (0, b_pad - batch)))
        gt_t = jnp.pad(gt_t, ((0, 0), (0, b_pad - batch)))

    tile_b = min(b_pad, _MAX_TILE_B)
    total_tiles = _cdiv(b_pad, tile_b)
    # Split the batch tiles across the (up to) 2 TensorCores whenever there is more than
    # one tile; on 1-TC chips the extra "parallel" axis simply runs serially.
    n_splits = 2 if total_tiles >= 2 else 1
    tiles_per_split = _cdiv(total_tiles, n_splits)
    need_mask = (n_splits * tiles_per_split * tile_b) != batch

    def pred_map(s, i):
        # Clamp so phantom trailing tiles (odd tile counts) stay in-bounds; their
        # contribution is zeroed by the lane mask inside the kernel.
        return (0, 0, jnp.minimum(s * tiles_per_split + i, total_tiles - 1))

    def gt_map(s, i):
        return (0, jnp.minimum(s * tiles_per_split + i, total_tiles - 1))

    kernel = functools.partial(
        _pwclonet_partial_kernel, batch=batch, tile_b=tile_b,
        tiles_per_split=tiles_per_split, total_tiles=total_tiles,
        need_mask=need_mask)

    partial_sums = pl.pallas_call(
        kernel,
        out_shape=jax.ShapeDtypeStruct((n_splits, 2 * NB_LEVELS, 1), jnp.float32),
        grid_spec=pltpu.PrefetchScalarGridSpec(
            num_scalar_prefetch=0,
            grid=(n_splits, tiles_per_split),
            in_specs=[
                pl.BlockSpec((NB_LEVELS, N_PARAMS, tile_b), pred_map),
                pl.BlockSpec((N_PARAMS, tile_b), gt_map),
            ],
            out_specs=pl.BlockSpec((None, 2 * NB_LEVELS, 1), lambda s, i: (s, 0, 0)),
            scratch_shapes=[pltpu.VMEM((2 * NB_LEVELS, tile_b), jnp.float32)],
        ),
        compiler_params=pltpu.CompilerParams(
            dimension_semantics=("parallel", "arbitrary")),
    )(pred_t, gt_t)

    # Tiny epilogue (a dozen (4,)-wide ops, once per call): combine the per-core partial
    # sums, turn them into means, apply ExponentialWeights / fixed weights and the
    # 1.6/0.8/0.4/0.2 level mix.
    sums = jnp.sum(partial_sums[:, :, 0], axis=0)           # (8,)
    loss_trans = sums[:NB_LEVELS] / (3.0 * batch)            # mean over B*3 elements
    loss_rot = sums[NB_LEVELS:] / float(batch)               # mean over B samples
    if with_exp_weights:
        loss_lvl = (loss_trans * jnp.exp(-s_param[0]) + s_param[0]
                    + loss_rot * jnp.exp(-s_param[1]) + s_param[1])
    else:
        loss_lvl = loss_trans * loss_weights[0] + loss_rot * loss_weights[1]
    mix = jnp.asarray(_LEVEL_MIX, dtype=jnp.float32)
    loss = jnp.sum(mix * loss_lvl)

    log_dict = {}
    for lvl in range(NB_LEVELS):
        log_dict[f"loss_rot_l{lvl + 1}"] = loss_rot[lvl]
        log_dict[f"loss_trans_l{lvl + 1}"] = loss_trans[lvl]
        if with_exp_weights:
            log_dict[f"s_rot_l{lvl + 1}"] = s_param[1]
            log_dict[f"s_trans_l{lvl + 1}"] = s_param[0]
        log_dict[f"loss_l{lvl + 1}"] = loss_lvl[lvl]
    log_dict["loss"] = loss
    if with_exp_weights:
        log_dict["s_param_trans"] = s_param[0]
        log_dict["s_param_rot"] = s_param[1]
    return loss, log_dict


def _reference_loss(pred_params, gt_params, s_param, loss_weights, with_exp_weights):
    """Plain-JAX re-implementation of the PyTorch forward pass (for cross-checking)."""
    pred = pred_params.astype(jnp.float32)
    gt = gt_params.astype(jnp.float32)
    gt_trans, gt_rot = gt[:, :N_TRANS], gt[:, N_TRANS:]
    level_losses = []
    for lvl in range(NB_LEVELS):
        p = pred[:, lvl, :]
        t, q = p[:, :N_TRANS], p[:, N_TRANS:]
        qn = q / (jnp.sqrt(jnp.sum(q * q, axis=-1, keepdims=True) + EPS) + EPS)
        loss_rot = jnp.mean(
            jnp.sqrt(jnp.sum((qn - gt_rot) ** 2, axis=-1, keepdims=True) + EPS))
        loss_trans = jnp.mean(jnp.sqrt((t - gt_trans) ** 2 + EPS))
        if with_exp_weights:
            lvl_loss = (loss_trans * jnp.exp(-s_param[0]) + s_param[0]
                        + loss_rot * jnp.exp(-s_param[1]) + s_param[1])
        else:
            lvl_loss = loss_trans * loss_weights[0] + loss_rot * loss_weights[1]
        level_losses.append(lvl_loss)
    return (1.6 * level_losses[3] + 0.8 * level_losses[2]
            + 0.4 * level_losses[1] + 0.2 * level_losses[0])


if __name__ == "__main__":
    key = jax.random.PRNGKey(0)
    k1, k2 = jax.random.split(key)

    batch = 2
    # pred_params: (B, nb_levels=4, 7); gt_params: (B, 7)
    pred_params = jax.random.normal(k1, (batch, NB_LEVELS, N_PARAMS), dtype=jnp.float32)
    gt_params = jax.random.normal(k2, (batch, N_PARAMS), dtype=jnp.float32)

    # PWCLONetLossConfig defaults: init_weights=[0.0, -2.5], loss_weights=[1.0, 1.0]
    s_param = jnp.array([0.0, -2.5], dtype=jnp.float32)
    loss_weights = jnp.array([1.0, 1.0], dtype=jnp.float32)

    loss, log_dict = pwclonet_loss(pred_params, gt_params, s_param, loss_weights,
                                   with_exp_weights=True)
    jax.block_until_ready(loss)
    jax.block_until_ready(log_dict)

    loss_fw, log_dict_fw = pwclonet_loss(pred_params, gt_params, s_param, loss_weights,
                                         with_exp_weights=False)
    jax.block_until_ready(loss_fw)
    jax.block_until_ready(log_dict_fw)

    # Cross-check both branches against the plain-JAX reference of the module forward.
    ref = _reference_loss(pred_params, gt_params, s_param, loss_weights, True)
    ref_fw = _reference_loss(pred_params, gt_params, s_param, loss_weights, False)
    assert abs(float(loss) - float(ref)) <= 1e-3 * max(1.0, abs(float(ref)))
    assert abs(float(loss_fw) - float(ref_fw)) <= 1e-3 * max(1.0, abs(float(ref_fw)))

    print("KERNEL_OK")
</pallas_src>

<mosaic_0001>
module attributes {stable_mosaic.version = 11 : i64} {
  func.func @_pwclonet_partial_kernel(%arg0: i32, %arg1: i32, %arg2: memref<4x7x128xf32, #tpu.memory_space<vmem>>, %arg3: memref<7x128xf32, #tpu.memory_space<vmem>>, %arg4: memref<1x8x1xf32, #tpu.memory_space<vmem>>, %arg5: memref<8x128xf32, #tpu.memory_space<vmem>>) attributes {dimension_semantics = [#tpu.dimension_semantics<parallel>, #tpu.dimension_semantics<arbitrary>], iteration_bounds = array<i64: 1, 1>, scalar_prefetch = 0 : i64, scratch_operands = 1 : i64, tpu.core_type = #tpu.core_type<tc>, window_params = [{transform_indices = @transform_0, window_bounds = array<i64: 4, 7, 128>}, {transform_indices = @transform_1, window_bounds = array<i64: 7, 128>}, {transform_indices = @transform_2, window_bounds = array<i64: 1, 8, 1>}]} {
    %c0_i32 = arith.constant 0 : i32
    %0 = arith.cmpi eq, %arg1, %c0_i32 : i32
    %1 = arith.extui %0 : i1 to i32
    %c0_i32_0 = arith.constant 0 : i32
    %2 = arith.cmpi ne, %1, %c0_i32_0 : i32
    scf.if %2 {
      %cst_21 = arith.constant 0.000000e+00 : f32
      %61 = vector.broadcast %cst_21 : f32 to vector<8x128xf32>
      %c0_22 = arith.constant 0 : index
      %c0_23 = arith.constant 0 : index
      %62 = vector.load %arg5[%c0_22, %c0_23] : memref<8x128xf32, #tpu.memory_space<vmem>>, vector<8x128xf32>
      tpu.vector_store %arg5[%c0_22, %c0_23], %61 {strides = array<i32>} : memref<8x128xf32, #tpu.memory_space<vmem>>, vector<8x128xf32>,
    } else {
    }
    %c0 = arith.constant 0 : index
    %c0_1 = arith.constant 0 : index
    %c0_2 = arith.constant 0 : index
    %3 = vector.load %arg2[%c0, %c0_1, %c0_2] : memref<4x7x128xf32, #tpu.memory_space<vmem>>, vector<4x7x128xf32>
    %c0_3 = arith.constant 0 : index
    %c0_4 = arith.constant 0 : index
    %4 = vector.load %arg3[%c0_3, %c0_4] : memref<7x128xf32, #tpu.memory_space<vmem>>, vector<7x128xf32>
    %5 = tpu.iota {dimensions = array<i32: 1>} : vector<1x7x1xi32>
    %c3_i32 = arith.constant 3 : i32
    %6 = vector.broadcast %c3_i32 : i32 to vector<1x7x1xi32>
    %7 = arith.cmpi sge, %5, %6 : vector<1x7x1xi32>
    %8 = arith.mulf %3, %3 : vector<4x7x128xf32>
    %cst = arith.constant 0.000000e+00 : f32
    %9 = vector.shape_cast %7 : vector<1x7x1xi1> to vector<1x7x1xi1>
    %10 = vector.broadcast %9 : vector<1x7x1xi1> to vector<4x7x128xi1>
    %11 = vector.broadcast %cst : f32 to vector<4x7x128xf32>
    %12 = arith.select %10, %8, %11 : vector<4x7x128xi1>, vector<4x7x128xf32>
    %cst_5 = arith.constant dense<0.000000e+00> : vector<4x128xf32>
    %13 = vector.multi_reduction <add>, %12, %cst_5 [1] : vector<4x7x128xf32> to vector<4x128xf32>
    %14 = vector.shape_cast %13 : vector<4x128xf32> to vector<4x1x128xf32>
    %cst_6 = arith.constant 1.000000e-10 : f32
    %15 = vector.broadcast %cst_6 : f32 to vector<4x1x128xf32>
    %16 = arith.addf %14, %15 : vector<4x1x128xf32>
    %17 = math.sqrt %16 : vector<4x1x128xf32>
    %cst_7 = arith.constant 1.000000e-10 : f32
    %18 = vector.broadcast %cst_7 : f32 to vector<4x1x128xf32>
    %19 = arith.addf %17, %18 : vector<4x1x128xf32>
    %20 = tpu.reciprocal %19 {approx = true} : vector<4x1x128xf32> -> vector<4x1x128xf32>
    %21 = arith.mulf %19, %20 : vector<4x1x128xf32>
    %cst_8 = arith.constant 2.000000e+00 : f32
    %22 = vector.broadcast %cst_8 : f32 to vector<4x1x128xf32>
    %23 = arith.subf %22, %21 : vector<4x1x128xf32>
    %24 = arith.mulf %20, %23 : vector<4x1x128xf32>
    %25 = vector.broadcast %24 : vector<4x1x128xf32> to vector<4x7x128xf32>
    %26 = arith.mulf %3, %25 : vector<4x7x128xf32>
    %27 = vector.shape_cast %7 : vector<1x7x1xi1> to vector<1x7x1xi1>
    %28 = vector.broadcast %27 : vector<1x7x1xi1> to vector<4x7x128xi1>
    %29 = arith.select %28, %26, %3 : vector<4x7x128xi1>, vector<4x7x128xf32>
    %30 = vector.shape_cast %4 : vector<7x128xf32> to vector<1x7x128xf32>
    %31 = vector.broadcast %30 : vector<1x7x128xf32> to vector<4x7x128xf32>
    %32 = arith.subf %29, %31 : vector<4x7x128xf32>
    %33 = arith.mulf %32, %32 : vector<4x7x128xf32>
    %cst_9 = arith.constant 1.000000e-10 : f32
    %34 = vector.broadcast %cst_9 : f32 to vector<4x7x128xf32>
    %35 = arith.addf %33, %34 : vector<4x7x128xf32>
    %36 = math.sqrt %35 : vector<4x7x128xf32>
    %cst_10 = arith.constant 0.000000e+00 : f32
    %37 = vector.shape_cast %7 : vector<1x7x1xi1> to vector<1x7x1xi1>
    %38 = vector.broadcast %37 : vector<1x7x1xi1> to vector<4x7x128xi1>
    %39 = vector.broadcast %cst_10 : f32 to vector<4x7x128xf32>
    %40 = arith.select %38, %39, %36 : vector<4x7x128xi1>, vector<4x7x128xf32>
    %cst_11 = arith.constant dense<0.000000e+00> : vector<4x128xf32>
    %41 = vector.multi_reduction <add>, %40, %cst_11 [1] : vector<4x7x128xf32> to vector<4x128xf32>
    %cst_12 = arith.constant 0.000000e+00 : f32
    %42 = vector.shape_cast %7 : vector<1x7x1xi1> to vector<1x7x1xi1>
    %43 = vector.broadcast %42 : vector<1x7x1xi1> to vector<4x7x128xi1>
    %44 = vector.broadcast %cst_12 : f32 to vector<4x7x128xf32>
    %45 = arith.select %43, %33, %44 : vector<4x7x128xi1>, vector<4x7x128xf32>
    %cst_13 = arith.constant dense<0.000000e+00> : vector<4x128xf32>
    %46 = vector.multi_reduction <add>, %45, %cst_13 [1] : vector<4x7x128xf32> to vector<4x128xf32>
    %cst_14 = arith.constant 1.000000e-10 : f32
    %47 = vector.broadcast %cst_14 : f32 to vector<4x128xf32>
    %48 = arith.addf %46, %47 : vector<4x128xf32>
    %49 = math.sqrt %48 : vector<4x128xf32>
    %c1_i32 = arith.constant 1 : i32
    %50 = arith.muli %arg0, %c1_i32 : i32
    %51 = arith.addi %50, %arg1 : i32
    %c0_i32_15 = arith.constant 0 : i32
    %52 = arith.cmpi slt, %51, %c0_i32_15 : i32
    %53 = arith.extui %52 : i1 to i32
    %c0_i32_16 = arith.constant 0 : i32
    %54 = arith.cmpi ne, %53, %c0_i32_16 : i32
    scf.if %54 {
      %c0_21 = arith.constant 0 : index
      %c0_22 = arith.constant 0 : index
      %61 = vector.load %arg5[%c0_21, %c0_22] : memref<8x128xf32, #tpu.memory_space<vmem>>, vector<4x128xf32>
      %62 = arith.addf %61, %41 : vector<4x128xf32>
      %c0_23 = arith.constant 0 : index
      %c0_24 = arith.constant 0 : index
      %63 = vector.load %arg5[%c0_23, %c0_24] : memref<8x128xf32, #tpu.memory_space<vmem>>, vector<4x128xf32>
      tpu.vector_store %arg5[%c0_23, %c0_24], %62 {strides = array<i32>} : memref<8x128xf32, #tpu.memory_space<vmem>>, vector<4x128xf32>,
      %c4 = arith.constant 4 : index
      %c0_25 = arith.constant 0 : index
      %64 = vector.load %arg5[%c4, %c0_25] : memref<8x128xf32, #tpu.memory_space<vmem>>, vector<4x128xf32>
      %65 = arith.addf %64, %49 : vector<4x128xf32>
      %c4_26 = arith.constant 4 : index
      %c0_27 = arith.constant 0 : index
      %66 = vector.load %arg5[%c4_26, %c0_27] : memref<8x128xf32, #tpu.memory_space<vmem>>, vector<4x128xf32>
      tpu.vector_store %arg5[%c4_26, %c0_27], %65 {strides = array<i32>} : memref<8x128xf32, #tpu.memory_space<vmem>>, vector<4x128xf32>,
    } else {
    }
    %c0_i32_17 = arith.constant 0 : i32
    %55 = arith.cmpi sge, %51, %c0_i32_17 : i32
    %56 = arith.extui %55 : i1 to i32
    %c0_i32_18 = arith.constant 0 : i32
    %57 = arith.cmpi ne, %56, %c0_i32_18 : i32
    scf.if %57 {
      %61 = tpu.iota {dimensions = array<i32: 1>} : vector<1x128xi32>
      %c128_i32 = arith.constant 128 : i32
      %62 = arith.muli %51, %c128_i32 : i32
      %63 = vector.broadcast %62 : i32 to vector<1x128xi32>
      %64 = arith.addi %63, %61 : vector<1x128xi32>
      %c2_i32 = arith.constant 2 : i32
      %65 = vector.broadcast %c2_i32 : i32 to vector<1x128xi32>
      %66 = arith.cmpi slt, %64, %65 : vector<1x128xi32>
      %c0_21 = arith.constant 0 : index
      %c0_22 = arith.constant 0 : index
      %67 = vector.load %arg5[%c0_21, %c0_22] : memref<8x128xf32, #tpu.memory_space<vmem>>, vector<4x128xf32>
      %cst_23 = arith.constant 0.000000e+00 : f32
      %68 = vector.shape_cast %66 : vector<1x128xi1> to vector<1x128xi1>
      %69 = vector.broadcast %68 : vector<1x128xi1> to vector<4x128xi1>
      %70 = vector.broadcast %cst_23 : f32 to vector<4x128xf32>
      %71 = arith.select %69, %41, %70 : vector<4x128xi1>, vector<4x128xf32>
      %72 = arith.addf %67, %71 : vector<4x128xf32>
      %c0_24 = arith.constant 0 : index
      %c0_25 = arith.constant 0 : index
      %73 = vector.load %arg5[%c0_24, %c0_25] : memref<8x128xf32, #tpu.memory_space<vmem>>, vector<4x128xf32>
      tpu.vector_store %arg5[%c0_24, %c0_25], %72 {strides = array<i32>} : memref<8x128xf32, #tpu.memory_space<vmem>>, vector<4x128xf32>,
      %c4 = arith.constant 4 : index
      %c0_26 = arith.constant 0 : index
      %74 = vector.load %arg5[%c4, %c0_26] : memref<8x128xf32, #tpu.memory_space<vmem>>, vector<4x128xf32>
      %cst_27 = arith.constant 0.000000e+00 : f32
      %75 = vector.shape_cast %66 : vector<1x128xi1> to vector<1x128xi1>
      %76 = vector.broadcast %75 : vector<1x128xi1> to vector<4x128xi1>
      %77 = vector.broadcast %cst_27 : f32 to vector<4x128xf32>
      %78 = arith.select %76, %49, %77 : vector<4x128xi1>, vector<4x128xf32>
      %79 = arith.addf %74, %78 : vector<4x128xf32>
      %c4_28 = arith.constant 4 : index
      %c0_29 = arith.constant 0 : index
      %80 = vector.load %arg5[%c4_28, %c0_29] : memref<8x128xf32, #tpu.memory_space<vmem>>, vector<4x128xf32>
      tpu.vector_store %arg5[%c4_28, %c0_29], %79 {strides = array<i32>} : memref<8x128xf32, #tpu.memory_space<vmem>>, vector<4x128xf32>,
    } else {
    }
    %c0_i32_19 = arith.constant 0 : i32
    %58 = arith.cmpi eq, %arg1, %c0_i32_19 : i32
    %59 = arith.extui %58 : i1 to i32
    %c0_i32_20 = arith.constant 0 : i32
    %60 = arith.cmpi ne, %59, %c0_i32_20 : i32
    scf.if %60 {
      %c0_21 = arith.constant 0 : index
      %c0_22 = arith.constant 0 : index
      %61 = vector.load %arg5[%c0_21, %c0_22] : memref<8x128xf32, #tpu.memory_space<vmem>>, vector<8x128xf32>
      %cst_23 = arith.constant dense<0.000000e+00> : vector<8xf32>
      %62 = vector.multi_reduction <add>, %61, %cst_23 [1] : vector<8x128xf32> to vector<8xf32>
      %63 = vector.shape_cast %62 : vector<8xf32> to vector<8x1xf32>
      %c0_24 = arith.constant 0 : index
      %c0_25 = arith.constant 0 : index
      %c0_26 = arith.constant 0 : index
      %64 = vector.load %arg4[%c0_24, %c0_25, %c0_26] : memref<1x8x1xf32, #tpu.memory_space<vmem>>, vector<1x8x1xf32>
      %65 = vector.shape_cast %64 : vector<1x8x1xf32> to vector<8x1xf32>
      %66 = vector.shape_cast %63 : vector<8x1xf32> to vector<1x8x1xf32>
      tpu.vector_store %arg4[%c0_24, %c0_25, %c0_26], %66 {strides = array<i32>} : memref<1x8x1xf32, #tpu.memory_space<vmem>>, vector<1x8x1xf32>,
    } else {
    }
    return
  }
  func.func @transform_0(%arg0: i32, %arg1: i32) -> (i32, i32, i32) {
    %c1_i32 = arith.constant 1 : i32
    %0 = arith.muli %arg0, %c1_i32 : i32
    %1 = arith.addi %0, %arg1 : i32
    %c0_i32 = arith.constant 0 : i32
    %2 = arith.minsi %1, %c0_i32 : i32
    %c0_i32_0 = arith.constant 0 : i32
    %c0_i32_1 = arith.constant 0 : i32
    %c0_i32_2 = arith.constant 0 : i32
    return %c0_i32_0, %c0_i32_1, %2 : i32, i32, i32
  }
  func.func @transform_1(%arg0: i32, %arg1: i32) -> (i32, i32) {
    %c1_i32 = arith.constant 1 : i32
    %0 = arith.muli %arg0, %c1_i32 : i32
    %1 = arith.addi %0, %arg1 : i32
    %c0_i32 = arith.constant 0 : i32
    %2 = arith.minsi %1, %c0_i32 : i32
    %c0_i32_0 = arith.constant 0 : i32
    %c0_i32_1 = arith.constant 0 : i32
    return %c0_i32_0, %2 : i32, i32
  }
  func.func @transform_2(%arg0: i32, %arg1: i32) -> (i32, i32, i32) {
    %c0_i32 = arith.constant 0 : i32
    %c0_i32_0 = arith.constant 0 : i32
    %c0_i32_1 = arith.constant 0 : i32
    return %arg0, %c0_i32, %c0_i32_0 : i32, i32, i32
  }
}

</mosaic_0001>

<bundles_post_ra>
// kernel: pwclonet_loss.1
= control target key start
LH: loop header
LB: loop body
LE: loop exit
PB: predicated region body
PF: predicated region fallthrough
CT: control target
= control target key end

     0   :  { %v75_v0 = vlaneseq  ;;  %v439_v1 = vmov 0.0   ;;  %vm88_vm0 = vcmask 1046528   ;;  %s564_s0 = inlined_call_operand.vmem [shape: f32[4,7,128], index: 0, kind: input, shape index: {}]   ;;  %s565_s1 = inlined_call_operand.vmem [shape: f32[7,128], index: 1, kind: input, shape index: {}]   ;;  %s566_s2 = inlined_call_operand.vmem [shape: f32[1,8,1], index: 2, kind: output, shape index: {}]  }
   0x1   :  { %69 = vst [vmem:[#allocation2] sm:$0xff] %v439_v1  ;;  %v458_v2 = vld [vmem:[%s564_s0] sm:$0x7f]  ;;  %v463_v3 = vld [vmem:[%s564_s0 + $0x8] sm:$0x7f] }
   0x2   :  { %v468_v4 = vld [vmem:[%s564_s0 + $0x10] sm:$0x7f]  ;;  %v473_v5 = vld [vmem:[%s564_s0 + $0x18] sm:$0x7f]  ;;  %v476_v6 = vshrl.u32 %v75_v0, 7  ;;  %v78_v7 = vmul.f32 %v458_v2, %v458_v2  ;;  %v79_v8 = vmul.f32 %v463_v3, %v463_v3 }
   0x3   :  { %v80_v9 = vmul.f32 %v468_v4, %v468_v4  ;;  %v81_v10 = vmul.f32 %v473_v5, %v473_v5 }
   0x4   :  { %vm77_vm1 = vcmp.ge.s32.totalorder %v476_v6, 3 }
   0x5   :  { %v84_v11 = vsel %vm77_vm1, %v78_v7, 0.0  ;;  %v85_v12 = vsel %vm77_vm1, %v79_v8, 0.0  ;;  %v86_v13 = vsel %vm77_vm1, %v80_v9, 0.0  ;;  %v87_v14 = vsel %vm77_vm1, %v81_v10, 0.0 }
   0x6   :  { %v89_v15 = vsel %vm88_vm0, %v84_v11, 0.0  ;;  %v96_v16 = vsel %vm88_vm0, %v85_v12, 0.0  ;;  %v103_v17 = vsel %vm88_vm0, %v86_v13, 0.0  ;;  %v110_v18 = vsel %vm88_vm0, %v87_v14, 0.0 }
   0x7   :  { %v90_v19 = vrot.slane %v89_v15, 4  ;;  %v97_v20 = vrot.slane %v96_v16, 4  ;;  %v104_v21 = vrot.slane %v103_v17, 4  ;;  %v111_v22 = vrot.slane %v110_v18, 4 }
   0x9   :  { %v91_v23 = vadd.f32 %v90_v19, %v89_v15  ;;  %v98_v24 = vadd.f32 %v97_v20, %v96_v16  ;;  %v105_v25 = vadd.f32 %v104_v21, %v103_v17  ;;  %v112_v26 = vadd.f32 %v111_v22, %v110_v18 }
   0xb   :  { %v92_v27 = vrot.slane %v91_v23, 2  ;;  %v99_v28 = vrot.slane %v98_v24, 2  ;;  %v106_v29 = vrot.slane %v105_v25, 2  ;;  %v113_v30 = vrot.slane %v112_v26, 2 }
   0xd   :  { %v93_v31 = vadd.f32 %v92_v27, %v91_v23  ;;  %v100_v32 = vadd.f32 %v99_v28, %v98_v24  ;;  %v107_v33 = vadd.f32 %v106_v29, %v105_v25  ;;  %v114_v34 = vadd.f32 %v113_v30, %v112_v26  ;;  %v74_v27 = vld [vmem:[%s565_s1] sm:$0x7f] }
   0xf   :  { %v94_v35 = vrot.slane %v93_v31, 1  ;;  %v101_v36 = vrot.slane %v100_v32, 1  ;;  %v108_v37 = vrot.slane %v107_v33, 1  ;;  %v115_v38 = vrot.slane %v114_v34, 1 }
  0x11   :  { %v95_v39 = vadd.f32 %v94_v35, %v93_v31  ;;  %v102_v40 = vadd.f32 %v101_v36, %v100_v32  ;;  %v109_v41 = vadd.f32 %v108_v37, %v107_v33  ;;  %v116_v42 = vadd.f32 %v115_v38, %v114_v34 }
  0x13   :  { %v117_v43 = vadd.f32 1e-10, %v95_v39  ;;  %v118_v44 = vadd.f32 1e-10, %v102_v40  ;;  %v119_v45 = vadd.f32 1e-10, %v109_v41 }
  0x14   :  { %v120_v46 = vadd.f32 1e-10, %v116_v42 }
  0x15   :  { %407 = vrsqrt.f32 %v117_v43  ;;  %vm123_vm2 = vcmp.eq.f32.partialorder %v117_v43, inf  ;;  %vm125_vm3 = vcmp.eq.f32.partialorder %v117_v43, 0.0  ;;  %v126_v48 = vand.u32 2147483648, %v117_v43 }
  0x16   :  { %409 = vrsqrt.f32 %v118_v44  ;;  %vm130_vm4 = vcmp.eq.f32.partialorder %v118_v44, inf  ;;  %vm132_vm5 = vcmp.eq.f32.partialorder %v118_v44, 0.0  ;;  %v133_v51 = vand.u32 2147483648, %v118_v44 }
  0x17   :  { %411 = vrsqrt.f32 %v119_v45  ;;  %vm137_vm6 = vcmp.eq.f32.partialorder %v119_v45, inf  ;;  %vm139_vm7 = vcmp.eq.f32.partialorder %v119_v45, 0.0  ;;  %v140_v54 = vand.u32 2147483648, %v119_v45 }
  0x18   :  { %413 = vrsqrt.f32 %v120_v46  ;;  %vm144_vm8 = vcmp.eq.f32.partialorder %v120_v46, inf  ;;  %v147_v58 = vand.u32 2147483648, %v120_v46  ;;  %vm146_vm9 = vcmp.eq.f32.partialorder %v120_v46, 0.0 }
  0x1f   :  { %v408_v47 = vpop.eup %407 }
  0x20   :  { %v410_v49 = vpop.eup %409  ;;  %v122_v50 = vmul.f32 %v408_v47, %v117_v43 }
  0x21   :  { %v412_v52 = vpop.eup %411  ;;  %v129_v53 = vmul.f32 %v410_v49, %v118_v44 }
  0x22   :  { %v414_v55 = vpop.eup %413  ;;  %v124_v56 = vsel %vm123_vm2, %v117_v43, %v122_v50  ;;  %v136_v57 = vmul.f32 %v412_v52, %v119_v45 }
  0x23   :  { %v127_v59 = vsel %vm125_vm3, %v126_v48, %v124_v56  ;;  %v131_v60 = vsel %vm130_vm4, %v118_v44, %v129_v53  ;;  %v143_v61 = vmul.f32 %v414_v55, %v120_v46  ;;  %vm364_vm4 = vcmask 1043459  }
  0x24   :  { %v134_v62 = vsel %vm132_vm5, %v133_v51, %v131_v60  ;;  %v138_v63 = vsel %vm137_vm6, %v119_v45, %v136_v57  ;;  %v149_v1 = vadd.f32 1e-10, %v127_v59 }
  0x25   :  { %v141_v7 = vsel %vm139_vm7, %v140_v54, %v138_v63  ;;  %v145_v8 = vsel %vm144_vm8, %v120_v46, %v143_v61  ;;  %v150_v9 = vadd.f32 1e-10, %v134_v62 }
  0x26   :  { %v148_v10 = vsel %vm146_vm9, %v147_v58, %v145_v8  ;;  %v151_v11 = vadd.f32 1e-10, %v141_v7  ;;  %415 = vrcp.f32 %v149_v1 }
  0x27   :  { %v152_v12 = vadd.f32 1e-10, %v148_v10  ;;  %417 = vrcp.f32 %v150_v9 }
  0x28   :  { %419 = vrcp.f32 %v151_v11 }
  0x29   :  { %421 = vrcp.f32 %v152_v12 }
  0x30   :  { %v416_v13 = vpop.eup %415 }
  0x31   :  { %v418_v14 = vpop.eup %417  ;;  %v157_v15 = vmul.f32 %v416_v13, %v149_v1 }
  0x32   :  { %v420_v16 = vpop.eup %419  ;;  %v158_v17 = vmul.f32 %v418_v14, %v150_v9 }
  0x33   :  { %v422_v18 = vpop.eup %421  ;;  %v159_v19 = vmul.f32 %v420_v16, %v151_v11  ;;  %v161_v20 = vsub.f32 2.0, %v157_v15 }
  0x34   :  { %v160_v21 = vmul.f32 %v422_v18, %v152_v12  ;;  %v162_v22 = vsub.f32 2.0, %v158_v17 }
  0x35   :  { %v163_v23 = vsub.f32 2.0, %v159_v19  ;;  %v165_v24 = vmul.f32 %v416_v13, %v161_v20 }
  0x36   :  { %v164_v25 = vsub.f32 2.0, %v160_v21  ;;  %v166_v26 = vmul.f32 %v418_v14, %v162_v22 }
  0x37   :  { %v167_v28 = vmul.f32 %v420_v16, %v163_v23  ;;  %v169_v29 = vmul.f32 %v165_v24, %v458_v2 }
  0x38   :  { %v168_v30 = vmul.f32 %v422_v18, %v164_v25  ;;  %v170_v31 = vmul.f32 %v166_v26, %v463_v3 }
  0x39   :  { %v171_v32 = vmul.f32 %v167_v28, %v468_v4  ;;  %v173_v33 = vsel %vm77_vm1, %v169_v29, %v458_v2 }
  0x3a   :  { %v172_v34 = vmul.f32 %v168_v30, %v473_v5  ;;  %v174_v35 = vsel %vm77_vm1, %v170_v31, %v463_v3  ;;  %v177_v36 = vsub.f32 %v173_v33, %v74_v27 }
  0x3b   :  { %v175_v37 = vsel %vm77_vm1, %v171_v32, %v468_v4  ;;  %v178_v38 = vsub.f32 %v174_v35, %v74_v27 }
  0x3c   :  { %v176_v39 = vsel %vm77_vm1, %v172_v34, %v473_v5  ;;  %v179_v40 = vsub.f32 %v175_v37, %v74_v27  ;;  %v181_v41 = vmul.f32 %v177_v36, %v177_v36 }
  0x3d   :  { %v180_v42 = vsub.f32 %v176_v39, %v74_v27  ;;  %v182_v2 = vmul.f32 %v178_v38, %v178_v38 }
  0x3e   :  { %v183_v43 = vmul.f32 %v179_v40, %v179_v40  ;;  %v185_v44 = vadd.f32 1e-10, %v181_v41  ;;  %v249_v3 = vsel %vm77_vm1, %v181_v41, 0.0 }
  0x3f   :  { %v184_v45 = vmul.f32 %v180_v42, %v180_v42  ;;  %v186_v46 = vadd.f32 1e-10, %v182_v2  ;;  %v250_v4 = vsel %vm77_vm1, %v182_v2, 0.0  ;;  %v253_v5 = vsel %vm88_vm0, %v249_v3, 0.0 }
  0x40   :  { %v187_v47 = vadd.f32 1e-10, %v183_v43  ;;  %423 = vrsqrt.f32 %v185_v44  ;;  %v251_v49 = vsel %vm77_vm1, %v183_v43, 0.0  ;;  %v254_v51 = vrot.slane %v253_v5, 4 }
  0x41   :  { %v188_v48 = vadd.f32 1e-10, %v184_v45  ;;  %425 = vrsqrt.f32 %v186_v46  ;;  %v252_v50 = vsel %vm77_vm1, %v184_v45, 0.0  ;;  %v260_v52 = vsel %vm88_vm0, %v250_v4, 0.0 }
  0x42   :  { %427 = vrsqrt.f32 %v187_v47  ;;  %v267_v53 = vsel %vm88_vm0, %v251_v49, 0.0  ;;  %v274_v54 = vsel %vm88_vm0, %v252_v50, 0.0  ;;  %vm191_vm10 = vcmp.eq.f32.partialorder %v185_v44, inf }
  0x43   :  { %429 = vrsqrt.f32 %v188_v48  ;;  %v261_v55 = vrot.slane %v260_v52, 4  ;;  %v268_v56 = vrot.slane %v267_v53, 4  ;;  %v275_v57 = vrot.slane %v274_v54, 4 }
  0x44   :  { %vm193_vm11 = vcmp.eq.f32.partialorder %v185_v44, 0.0  ;;  %v194_v58 = vand.u32 2147483648, %v185_v44  ;;  %vm198_vm12 = vcmp.eq.f32.partialorder %v186_v46, inf  ;;  %v255_v59 = vadd.f32 %v254_v51, %v253_v5 }
  0x45   :  { %vm200_vm13 = vcmp.eq.f32.partialorder %v186_v46, 0.0  ;;  %v262_v60 = vadd.f32 %v261_v55, %v260_v52  ;;  %v269_v61 = vadd.f32 %v268_v56, %v267_v53  ;;  %v276_v62 = vadd.f32 %v275_v57, %v274_v54 }
  0x46   :  { %v201_v63 = vand.u32 2147483648, %v186_v46  ;;  %vm205_vm14 = vcmp.eq.f32.partialorder %v187_v47, inf  ;;  %vm207_vm15 = vcmp.eq.f32.partialorder %v187_v47, 0.0  ;;  %v256_v1 = vrot.slane %v255_v59, 2 }
  0x47   :  { %v208_v8 = vand.u32 2147483648, %v187_v47  ;;  %v263_v9 = vrot.slane %v262_v60, 2  ;;  %v270_v10 = vrot.slane %v269_v61, 2  ;;  %v277_v11 = vrot.slane %v276_v62, 2 }
  0x48   :  { %vm212_vm2 = vcmp.eq.f32.partialorder %v188_v48, inf  ;;  %vm214_vm3 = vcmp.eq.f32.partialorder %v188_v48, 0.0  ;;  %v257_v14 = vadd.f32 %v256_v1, %v255_v59  ;;  %v215_v17 = vand.u32 2147483648, %v188_v48 }
  0x49   :  { %v264_v18 = vadd.f32 %v263_v9, %v262_v60  ;;  %v271_v19 = vadd.f32 %v270_v10, %v269_v61  ;;  %v278_v24 = vadd.f32 %v277_v11, %v276_v62 }
  0x4a   :  { %v424_v7 = vpop.eup %423  ;;  %v258_v23 = vrot.slane %v257_v14, 1 }
  0x4b   :  { %v426_v12 = vpop.eup %425  ;;  %v190_v13 = vmul.f32 %v424_v7, %v185_v44  ;;  %v265_v28 = vrot.slane %v264_v18, 1  ;;  %v272_v3 = vrot.slane %v271_v19, 1  ;;  %v279_v4 = vrot.slane %v278_v24, 1 }
  0x4c   :  { %v428_v15 = vpop.eup %427  ;;  %v197_v16 = vmul.f32 %v426_v12, %v186_v46  ;;  %v259_v32 = vadd.f32 %v258_v23, %v257_v14  ;;  %v348_v7 = vand.u32 127, %v75_v0 }
  0x4d   :  { %v430_v20 = vpop.eup %429  ;;  %v192_v21 = vsel %vm191_vm10, %v185_v44, %v190_v13  ;;  %v204_v22 = vmul.f32 %v428_v15, %v187_v47  ;;  %v266_v43 = vadd.f32 %v265_v28, %v264_v18  ;;  %v273_v51 = vadd.f32 %v272_v3, %v271_v19  ;;  %v353_v15 = vld [vmem:[#allocation2] sm:$0xf] }
  0x4e   :  { %v195_v25 = vsel %vm193_vm11, %v194_v58, %v192_v21  ;;  %v199_v26 = vsel %vm198_vm12, %v186_v46, %v197_v16  ;;  %v211_v27 = vmul.f32 %v430_v20, %v188_v48  ;;  %v281_v5 = vadd.f32 1e-10, %v259_v32 }
  0x4f   :  { %v202_v29 = vsel %vm200_vm13, %v201_v63, %v199_v26  ;;  %v206_v30 = vsel %vm205_vm14, %v187_v47, %v204_v22  ;;  %v217_v31 = vsel %vm77_vm1, 0.0, %v195_v25  ;;  %v282_v52 = vadd.f32 1e-10, %v266_v43 }
  0x50   :  { %v209_v33 = vsel %vm207_vm15, %v208_v8, %v206_v30  ;;  %v213_v34 = vsel %vm212_vm2, %v188_v48, %v211_v27  ;;  %v218_v35 = vsel %vm77_vm1, 0.0, %v202_v29  ;;  %v221_v36 = vsel %vm88_vm0, %v217_v31, 0.0 }
  0x51   :  { %v216_v37 = vsel %vm214_vm3, %v215_v17, %v213_v34  ;;  %v219_v38 = vsel %vm77_vm1, 0.0, %v209_v33  ;;  %v222_v39 = vrot.slane %v221_v36, 4  ;;  %v228_v40 = vsel %vm88_vm0, %v218_v35, 0.0 }
  0x52   :  { %v220_v41 = vsel %vm77_vm1, 0.0, %v216_v37  ;;  %v229_v42 = vrot.slane %v228_v40, 4  ;;  %v235_v2 = vsel %vm88_vm0, %v219_v38, 0.0  ;;  %v280_v54 = vadd.f32 %v279_v4, %v278_v24 }
  0x53   :  { %v223_v44 = vadd.f32 %v222_v39, %v221_v36  ;;  %v236_v45 = vrot.slane %v235_v2, 4  ;;  %v242_v46 = vsel %vm88_vm0, %v220_v41, 0.0  ;;  %431 = vrsqrt.f32 %v281_v5  ;;  %v370_v41 = vld [vmem:[#allocation2 + $0x4] sm:$0xf] }
  0x54   :  { %v230_v47 = vadd.f32 %v229_v42, %v228_v40  ;;  %v243_v48 = vrot.slane %v242_v46, 4  ;;  %v283_v57 = vadd.f32 1e-10, %v273_v51  ;;  %v284_v62 = vadd.f32 1e-10, %v280_v54 }
  0x55   :  { %v224_v49 = vrot.slane %v223_v44, 2  ;;  %v237_v50 = vadd.f32 %v236_v45, %v235_v2  ;;  %433 = vrsqrt.f32 %v282_v52  ;;  %vm360_vm0 = vcmask 1041409  }
  0x56   :  { %v231_v53 = vrot.slane %v230_v47, 2  ;;  %v244_v6 = vadd.f32 %v243_v48, %v242_v46  ;;  %435 = vrsqrt.f32 %v283_v57  ;;  %vm362_vm1 = vcmask 1042434  }
  0x57   :  { %v225_v55 = vadd.f32 %v224_v49, %v223_v44  ;;  %v238_v56 = vrot.slane %v237_v50, 2  ;;  %437 = vrsqrt.f32 %v284_v62  ;;  %vm352_vm5 = vcmp.lt.s32.totalorder %v348_v7, 2 }
  0x58   :  { %v232_v58 = vadd.f32 %v231_v53, %v230_v47  ;;  %v245_v59 = vrot.slane %v244_v6, 2  ;;  %vm287_vm6 = vcmp.eq.f32.partialorder %v281_v5, inf  ;;  %v290_v19 = vand.u32 2147483648, %v281_v5 }
  0x59   :  { %v226_v60 = vrot.slane %v225_v55, 1  ;;  %v239_v61 = vadd.f32 %v238_v56, %v237_v50  ;;  %vm289_vm7 = vcmp.eq.f32.partialorder %v281_v5, 0.0  ;;  %vm294_vm8 = vcmp.eq.f32.partialorder %v282_v52, inf }
  0x5a   :  { %v233_v63 = vrot.slane %v232_v58, 1  ;;  %v246_v1 = vadd.f32 %v245_v59, %v244_v6  ;;  %v297_v24 = vand.u32 2147483648, %v282_v52  ;;  %vm296_vm9 = vcmp.eq.f32.partialorder %v282_v52, 0.0 }
  0x5b   :  { %v227_v8 = vadd.f32 %v226_v60, %v225_v55  ;;  %v240_v9 = vrot.slane %v239_v61, 1  ;;  %vm301_vm10 = vcmp.eq.f32.partialorder %v283_v57, inf  ;;  %v304_v28 = vand.u32 2147483648, %v283_v57 }
  0x5c   :  { %v234_v10 = vadd.f32 %v233_v63, %v232_v58  ;;  %v247_v11 = vrot.slane %v246_v1, 1  ;;  %vm303_vm11 = vcmp.eq.f32.partialorder %v283_v57, 0.0  ;;  %vm308_vm12 = vcmp.eq.f32.partialorder %v284_v62, inf }
  0x5d   :  { %v241_v12 = vadd.f32 %v240_v9, %v239_v61  ;;  %v432_v17 = vpop.eup %431  ;;  %v311_v33 = vand.u32 2147483648, %v284_v62  ;;  %vm310_vm13 = vcmp.eq.f32.partialorder %v284_v62, 0.0  ;;  %vm388_vm14 = vcmask 7168  }
  0x5e   :  { %v248_v13 = vadd.f32 %v247_v11, %v246_v1  ;;  %v361_v14 = vsel %vm360_vm0, %v234_v10, %v227_v8  ;;  %v286_v18 = vmul.f32 %v432_v17, %v281_v5 }
  0x5f   :  { %v363_v16 = vsel %vm362_vm1, %v241_v12, %v361_v14  ;;  %v434_v22 = vpop.eup %433 }
  0x60   :  { %v365_v0 = vsel %vm364_vm4, %v248_v13, %v363_v16  ;;  %v288_v23 = vsel %vm287_vm6, %v281_v5, %v286_v18  ;;  %v293_v25 = vmul.f32 %v434_v22, %v282_v52  ;;  %v436_v26 = vpop.eup %435 }
  0x61   :  { %v367_v20 = vsel %vm352_vm5, %v365_v0, 0.0  ;;  %v291_v27 = vsel %vm289_vm7, %v290_v19, %v288_v23  ;;  %v300_v30 = vmul.f32 %v436_v26, %v283_v57  ;;  %v438_v31 = vpop.eup %437 }
  0x62   :  { %v368_v21 = vadd.f32 %v367_v20, %v353_v15  ;;  %v295_v29 = vsel %vm294_vm8, %v282_v52, %v293_v25  ;;  %v307_v35 = vmul.f32 %v438_v31, %v284_v62 }
  0x63   :  { %v298_v32 = vsel %vm296_vm9, %v297_v24, %v295_v29  ;;  %v302_v34 = vsel %vm301_vm10, %v283_v57, %v300_v30 }
  0x64   :  { %369 = vst [vmem:[#allocation2] sm:$0xf] %v368_v21  ;;  %v375_v36 = vsel %vm360_vm0, %v298_v32, %v291_v27  ;;  %v305_v37 = vsel %vm303_vm11, %v304_v28, %v302_v34  ;;  %v309_v38 = vsel %vm308_vm12, %v284_v62, %v307_v35 }
  0x65   :  { %v376_v39 = vsel %vm362_vm1, %v305_v37, %v375_v36  ;;  %v312_v40 = vsel %vm310_vm13, %v311_v33, %v309_v38 }
  0x66   :  { %v377_v42 = vsel %vm364_vm4, %v312_v40, %v376_v39 }
  0x67   :  { %v379_v2 = vsel %vm352_vm5, %v377_v42, 0.0 }
  0x68   :  { %v380_v43 = vadd.f32 %v379_v2, %v370_v41 }
  0x6a   :  { %381 = vst [vmem:[#allocation2 + $0x4] sm:$0xf] %v380_v43 }
  0x71   :  { %v385_v44 = vld [vmem:[#allocation2] sm:$0xff] }
  0x72   :  { %386 = vadd.xlane.f32.xlu0 %v385_v44 }
  0xff   :  { %v387_v45 = vpop.xlane.xlu0 %386 }
 0x100   :  { %389 = vst.msk [vmem:[%s566_s2] sm:$0xff] %vm388_vm14, %v387_v45 }

</bundles_post_ra>
